<compile_context>
chip_gen: v6e
topology: v6e:2x2x1
jax: 0.10.0
libtpu: 0.0.40
codegen_flags: <defaults>
</compile_context>

<pallas_src>
import functools

import jax
import jax.numpy as jnp
from jax.experimental import pallas as pl
from jax.experimental.pallas import tpu as pltpu


def _round_up(x, m):
    return (x + m - 1) // m * m


def _mlp_kernel(num_hidden, *refs):
    """refs = (x_ref, W1, b1, W2, b2, ..., Wout, bout, out_ref).

    Weights are pre-transposed to (in, out) so every layer is a plain `h @ W`
    on the MXU with f32 accumulation. Biases are (1, out) f32; bias add and
    ReLU run in f32 on the VPU (v5e has no bf16 VPU path).
    """
    x_ref = refs[0]
    out_ref = refs[-1]
    param_refs = refs[1:-1]

    h = x_ref[...]                                   # (tile_n, d_in_pad), matmul dtype
    for i in range(num_hidden + 1):
        w = param_refs[2 * i][...]                   # (in_pad, out_pad)
        b = param_refs[2 * i + 1][...]               # (1, out_pad) f32
        h = jnp.dot(h.astype(w.dtype), w, preferred_element_type=jnp.float32) + b
        if i < num_hidden:                           # hidden layers get ReLU
            h = jnp.maximum(h, 0.0)
    out_ref[...] = h.astype(out_ref.dtype)


def prepare_params(params, *, param_dtype=jnp.bfloat16, lane_multiple=128):
    """One-time parameter preparation (do NOT call per forward pass).

    Takes PyTorch-convention (out, in) weights, transposes to (in, out), casts
    to `param_dtype`, and zero-pads every layer width to a multiple of
    `lane_multiple` lanes (use 256 on v6e/v7x to match the 2x256x256 MXU).
    Zero padding is exact: padded activations are ReLU(0)=0 and padded output
    columns are sliced off by the wrapper.
    """
    out_dim = int(params[-1][0].shape[0])
    d_in = int(params[0][0].shape[1])
    d_in_pad = _round_up(d_in, lane_multiple)

    layers = []
    prev_raw, prev_pad = d_in, d_in_pad
    for (w, b) in params:
        w = jnp.asarray(w, jnp.float32)
        b = jnp.asarray(b, jnp.float32)
        o_raw = int(w.shape[0])
        o_pad = _round_up(o_raw, lane_multiple)
        wt = w.T.astype(param_dtype)                                 # (in, out)
        wt = jnp.pad(wt, ((0, prev_pad - prev_raw), (0, o_pad - o_raw)))
        b2d = jnp.pad(b.reshape(1, -1), ((0, 0), (0, o_pad - o_raw)))
        layers.append((wt, b2d))
        prev_raw, prev_pad = o_raw, o_pad

    return {
        "layers": layers,
        "out_dim": out_dim,
        "in_dim": d_in,
        "in_dim_pad": d_in_pad,
        "param_dtype": jnp.dtype(param_dtype),
    }


def fully_connected_net(x, prepared, *, tile_n=256):
    """Forward pass of FullyConnectedNet as a single Pallas kernel.

    Args:
      x: (N, ...) input; flattened row-major to (N, D) like torch `x.view(N,-1)`.
      prepared: output of `prepare_params` (transposed/cast/padded weights).
      tile_n: batch rows per grid step (v6e with large batches: sweep up to 512
              after checking the VMEM budget).
    Returns: (N, output_dim) float32.
    """
    layers = prepared["layers"]
    out_dim = prepared["out_dim"]
    d_in = prepared["in_dim"]
    d_in_pad = prepared["in_dim_pad"]
    pdt = prepared["param_dtype"]
    num_hidden = len(layers) - 1

    n = x.shape[0]
    # torch `x.view(N, -1)`; cast to the matmul dtype here so the streamed x
    # tile is half-width for bf16 and no per-step in-kernel cast is needed.
    x2d = x.reshape(n, -1).astype(pdt)
    assert x2d.shape[1] == d_in, "input feature dim does not match prepared params"
    if d_in_pad != d_in:
        x2d = jnp.pad(x2d, ((0, 0), (0, d_in_pad - d_in)))

    # Batch tiling: 16-sublane multiple for bf16 packing, 8 for f32.
    sub = 16 if pdt == jnp.bfloat16 else 8
    n_sub = _round_up(n, sub)
    tile_n = max(sub, min(_round_up(tile_n, sub), n_sub))
    # vreg-pressure guard: the live intermediate h (tile_n, widest hidden) should
    # stay within the 256 KiB vreg file; otherwise drop to 128 rows.
    hidden_widths = [int(w.shape[1]) for w, _ in layers[:-1]]
    if hidden_widths and tile_n > 128 and tile_n * max(hidden_widths) * 4 > 256 * 1024:
        tile_n = 128
    # v7x has 2 TensorCores: give the "parallel" batch axis >= 2 grid steps
    # whenever the batch allows so both cores get work.
    if n_sub // tile_n < 2 and n_sub >= 2 * sub:
        tile_n = _round_up((n_sub + 1) // 2, sub)
    n_pad = _round_up(n, tile_n)
    if n_pad != n:
        x2d = jnp.pad(x2d, ((0, n_pad - n), (0, 0)))

    out_pad = int(layers[-1][1].shape[1])
    flat_params = []
    for wt, b2d in layers:
        flat_params += [wt, b2d]

    # VMEM budget: resident weights/biases (single-buffered) + double-buffered
    # streamed x tile and out tile.
    itemsize = jnp.dtype(pdt).itemsize
    weight_bytes = sum(int(w.size) * w.dtype.itemsize + int(b.size) * b.dtype.itemsize
                       for w, b in layers)
    x_tile_bytes = tile_n * d_in_pad * itemsize
    out_tile_bytes = tile_n * out_pad * 4
    vmem_needed = weight_bytes + 2 * x_tile_bytes + 2 * out_tile_bytes
    if vmem_needed > 56 * 2**20:
        # TODO(synk): stream weight N-slabs (second grid axis / emit_pipeline)
        # when the resident-weight design does not fit v7x's 64 MiB VMEM.
        raise NotImplementedError(
            "resident-weight MLP exceeds the v7x VMEM budget; needs the "
            "N-slab streaming fallback")
    # Generous headroom; covers the double-buffered-weight fallback path too.
    vmem_limit = int(min(2 * weight_bytes + 2 * (x_tile_bytes + out_tile_bytes)
                         + 8 * 2**20, 64 * 2**20))

    flops = sum(2 * int(n_pad) * int(w.shape[0]) * int(w.shape[1]) for w, _ in layers)
    bytes_accessed = int(x2d.size) * itemsize + n_pad * out_pad * 4 + weight_bytes

    kernel = functools.partial(_mlp_kernel, num_hidden)
    x_spec = pl.BlockSpec((tile_n, d_in_pad), lambda i: (i, 0))
    out_spec = pl.BlockSpec((tile_n, out_pad), lambda i: (i, 0))

    def run(single_buffer_weights):
        in_specs = [x_spec]
        for wt, b2d in layers:
            if single_buffer_weights:
                # Constant index_map -> resident in VMEM; no second buffer needed.
                in_specs += [
                    pl.BlockSpec(wt.shape, lambda i: (0, 0),
                                 pipeline_mode=pl.Buffered(1)),
                    pl.BlockSpec(b2d.shape, lambda i: (0, 0),
                                 pipeline_mode=pl.Buffered(1)),
                ]
            else:
                in_specs += [
                    pl.BlockSpec(wt.shape, lambda i: (0, 0)),
                    pl.BlockSpec(b2d.shape, lambda i: (0, 0)),
                ]
        return pl.pallas_call(
            kernel,
            out_shape=jax.ShapeDtypeStruct((n_pad, out_pad), jnp.float32),
            grid=(n_pad // tile_n,),
            in_specs=in_specs,
            out_specs=out_spec,
            compiler_params=pltpu.CompilerParams(
                dimension_semantics=("parallel",),
                vmem_limit_bytes=vmem_limit),
            cost_estimate=pl.CostEstimate(
                flops=int(flops), transcendentals=0,
                bytes_accessed=int(bytes_accessed)),
        )(x2d, *flat_params)

    try:
        out = run(True)
    except Exception:
        # pipeline_mode=pl.Buffered(1) not supported by this jax build:
        # retry with default (double) buffering. Genuine bugs re-raise here.
        out = run(False)

    return out[:n, :out_dim]


def init_params(key, input_dim, hidden_dims, output_dim):
    """Deterministic init mirroring nn.Linear's U(-1/sqrt(in), 1/sqrt(in))."""
    dims = [input_dim] + list(hidden_dims) + [output_dim]
    params = []
    for i in range(len(dims) - 1):
        fan_in, fan_out = dims[i], dims[i + 1]
        key, kw, kb = jax.random.split(key, 3)
        bound = 1.0 / (fan_in ** 0.5)
        w = jax.random.uniform(kw, (fan_out, fan_in), jnp.float32, -bound, bound)
        b = jax.random.uniform(kb, (fan_out,), jnp.float32, -bound, bound)
        params.append((w, b))
    return params


def reference_forward(x, params, param_dtype=jnp.float32):
    """Plain-JAX reference of the PyTorch forward (optionally bf16 matmuls)."""
    prec = jax.lax.Precision.HIGHEST if param_dtype == jnp.float32 else None
    h = x.reshape(x.shape[0], -1).astype(jnp.float32)
    for w, b in params[:-1]:
        y = jnp.dot(h.astype(param_dtype), jnp.asarray(w).T.astype(param_dtype),
                    preferred_element_type=jnp.float32, precision=prec) + b
        h = jnp.maximum(y, 0.0)
    w, b = params[-1]
    return jnp.dot(h.astype(param_dtype), jnp.asarray(w).T.astype(param_dtype),
                   preferred_element_type=jnp.float32, precision=prec) + b


if __name__ == "__main__":
    key = jax.random.PRNGKey(0)

    batch, C, H, W = 2, 4, 16, 16
    input_dim = C * H * W          # 1024
    hidden_dims = [64, 32]
    output_dim = 10

    kx, kp = jax.random.split(key)
    x = jax.random.normal(kx, (batch, C, H, W), jnp.float32)
    params = init_params(kp, input_dim, hidden_dims, output_dim)

    # One-time parameter prep (hoisted out of the forward path).
    prep_bf16 = prepare_params(params, param_dtype=jnp.bfloat16)
    prep_f32 = prepare_params(params, param_dtype=jnp.float32)

    # Default path: bf16 matmul operands, f32 accumulation (MXU-native).
    out_bf16 = jax.block_until_ready(fully_connected_net(x, prep_bf16))
    ref_bf16 = reference_forward(x, params, jnp.bfloat16)
    assert out_bf16.shape == (batch, output_dim)
    assert jnp.allclose(out_bf16, ref_bf16, atol=2e-3, rtol=2e-3), \
        "bf16 kernel mismatch vs bf16 reference"

    # f32 path: mirrors the PyTorch module's f32 math (slower multi-pass MXU).
    out_f32 = jax.block_until_ready(fully_connected_net(x, prep_f32))
    ref_f32 = reference_forward(x, params, jnp.float32)
    assert out_f32.shape == (batch, output_dim)
    assert jnp.allclose(out_f32, ref_f32, atol=2e-3, rtol=2e-3), \
        "f32 kernel mismatch vs f32 reference"

    print("KERNEL_OK")
</pallas_src>

<mosaic_0001>
module attributes {stable_mosaic.version = 11 : i64} {
  func.func @_mlp_kernel(%arg0: i32, %arg1: memref<16x1024xbf16, #tpu.memory_space<vmem>>, %arg2: memref<1024x128xbf16, #tpu.memory_space<vmem>>, %arg3: memref<1x128xf32, #tpu.memory_space<vmem>>, %arg4: memref<128x128xbf16, #tpu.memory_space<vmem>>, %arg5: memref<1x128xf32, #tpu.memory_space<vmem>>, %arg6: memref<128x128xbf16, #tpu.memory_space<vmem>>, %arg7: memref<1x128xf32, #tpu.memory_space<vmem>>, %arg8: memref<16x128xf32, #tpu.memory_space<vmem>>) attributes {dimension_semantics = [#tpu.dimension_semantics<parallel>], iteration_bounds = array<i64: 1>, scalar_prefetch = 0 : i64, scratch_operands = 0 : i64, tpu.core_type = #tpu.core_type<tc>, window_params = [{transform_indices = @transform_0, window_bounds = array<i64: 16, 1024>}, {pipeline_mode = #tpu.pipeline_mode<synchronous>, transform_indices = @transform_1, window_bounds = array<i64: 1024, 128>}, {pipeline_mode = #tpu.pipeline_mode<synchronous>, transform_indices = @transform_2, window_bounds = array<i64: 1, 128>}, {pipeline_mode = #tpu.pipeline_mode<synchronous>, transform_indices = @transform_3, window_bounds = array<i64: 128, 128>}, {pipeline_mode = #tpu.pipeline_mode<synchronous>, transform_indices = @transform_4, window_bounds = array<i64: 1, 128>}, {pipeline_mode = #tpu.pipeline_mode<synchronous>, transform_indices = @transform_5, window_bounds = array<i64: 128, 128>}, {pipeline_mode = #tpu.pipeline_mode<synchronous>, transform_indices = @transform_6, window_bounds = array<i64: 1, 128>}, {transform_indices = @transform_7, window_bounds = array<i64: 16, 128>}]} {
    %c0 = arith.constant 0 : index
    %c0_0 = arith.constant 0 : index
    %0 = vector.load %arg1[%c0, %c0_0] : memref<16x1024xbf16, #tpu.memory_space<vmem>>, vector<16x1024xbf16>
    %c0_1 = arith.constant 0 : index
    %c0_2 = arith.constant 0 : index
    %1 = vector.load %arg2[%c0_1, %c0_2] : memref<1024x128xbf16, #tpu.memory_space<vmem>>, vector<1024x128xbf16>
    %c0_3 = arith.constant 0 : index
    %c0_4 = arith.constant 0 : index
    %2 = vector.load %arg3[%c0_3, %c0_4] : memref<1x128xf32, #tpu.memory_space<vmem>>, vector<1x128xf32>
    %cst = arith.constant dense<0.000000e+00> : vector<16x128xf32>
    %3 = tpu.matmul %0, %1, %cst {dimension_numbers = #tpu.dot_dimension_numbers<[1], [0], [0], [1], [0, 0, 1, 1], [], []>} : vector<16x1024xbf16>, vector<1024x128xbf16>, vector<16x128xf32> -> vector<16x128xf32>
    %4 = vector.broadcast %2 : vector<1x128xf32> to vector<16x128xf32>
    %5 = arith.addf %3, %4 : vector<16x128xf32>
    %cst_5 = arith.constant 0.000000e+00 : f32
    %6 = vector.broadcast %cst_5 : f32 to vector<16x128xf32>
    %7 = arith.maximumf %5, %6 : vector<16x128xf32>
    %c0_6 = arith.constant 0 : index
    %c0_7 = arith.constant 0 : index
    %8 = vector.load %arg4[%c0_6, %c0_7] : memref<128x128xbf16, #tpu.memory_space<vmem>>, vector<128x128xbf16>
    %c0_8 = arith.constant 0 : index
    %c0_9 = arith.constant 0 : index
    %9 = vector.load %arg5[%c0_8, %c0_9] : memref<1x128xf32, #tpu.memory_space<vmem>>, vector<1x128xf32>
    %10 = arith.truncf %7 : vector<16x128xf32> to vector<16x128xbf16>
    %cst_10 = arith.constant dense<0.000000e+00> : vector<16x128xf32>
    %11 = tpu.matmul %10, %8, %cst_10 {dimension_numbers = #tpu.dot_dimension_numbers<[1], [0], [0], [1], [0, 0, 1, 1], [], []>} : vector<16x128xbf16>, vector<128x128xbf16>, vector<16x128xf32> -> vector<16x128xf32>
    %12 = vector.broadcast %9 : vector<1x128xf32> to vector<16x128xf32>
    %13 = arith.addf %11, %12 : vector<16x128xf32>
    %cst_11 = arith.constant 0.000000e+00 : f32
    %14 = vector.broadcast %cst_11 : f32 to vector<16x128xf32>
    %15 = arith.maximumf %13, %14 : vector<16x128xf32>
    %c0_12 = arith.constant 0 : index
    %c0_13 = arith.constant 0 : index
    %16 = vector.load %arg6[%c0_12, %c0_13] : memref<128x128xbf16, #tpu.memory_space<vmem>>, vector<128x128xbf16>
    %c0_14 = arith.constant 0 : index
    %c0_15 = arith.constant 0 : index
    %17 = vector.load %arg7[%c0_14, %c0_15] : memref<1x128xf32, #tpu.memory_space<vmem>>, vector<1x128xf32>
    %18 = arith.truncf %15 : vector<16x128xf32> to vector<16x128xbf16>
    %cst_16 = arith.constant dense<0.000000e+00> : vector<16x128xf32>
    %19 = tpu.matmul %18, %16, %cst_16 {dimension_numbers = #tpu.dot_dimension_numbers<[1], [0], [0], [1], [0, 0, 1, 1], [], []>} : vector<16x128xbf16>, vector<128x128xbf16>, vector<16x128xf32> -> vector<16x128xf32>
    %20 = vector.broadcast %17 : vector<1x128xf32> to vector<16x128xf32>
    %21 = arith.addf %19, %20 : vector<16x128xf32>
    %c0_17 = arith.constant 0 : index
    %c0_18 = arith.constant 0 : index
    %22 = vector.load %arg8[%c0_17, %c0_18] : memref<16x128xf32, #tpu.memory_space<vmem>>, vector<16x128xf32>
    tpu.vector_store %arg8[%c0_17, %c0_18], %21 {strides = array<i32>} : memref<16x128xf32, #tpu.memory_space<vmem>>, vector<16x128xf32>,
    return
  }
  func.func @transform_0(%arg0: i32) -> (i32, i32) {
    %c0_i32 = arith.constant 0 : i32
    %c0_i32_0 = arith.constant 0 : i32
    return %arg0, %c0_i32 : i32, i32
  }
  func.func @transform_1(%arg0: i32) -> (i32, i32) {
    %c0_i32 = arith.constant 0 : i32
    %c0_i32_0 = arith.constant 0 : i32
    %c0_i32_1 = arith.constant 0 : i32
    return %c0_i32, %c0_i32_0 : i32, i32
  }
  func.func @transform_2(%arg0: i32) -> (i32, i32) {
    %c0_i32 = arith.constant 0 : i32
    %c0_i32_0 = arith.constant 0 : i32
    %c0_i32_1 = arith.constant 0 : i32
    return %c0_i32, %c0_i32_0 : i32, i32
  }
  func.func @transform_3(%arg0: i32) -> (i32, i32) {
    %c0_i32 = arith.constant 0 : i32
    %c0_i32_0 = arith.constant 0 : i32
    %c0_i32_1 = arith.constant 0 : i32
    return %c0_i32, %c0_i32_0 : i32, i32
  }
  func.func @transform_4(%arg0: i32) -> (i32, i32) {
    %c0_i32 = arith.constant 0 : i32
    %c0_i32_0 = arith.constant 0 : i32
    %c0_i32_1 = arith.constant 0 : i32
    return %c0_i32, %c0_i32_0 : i32, i32
  }
  func.func @transform_5(%arg0: i32) -> (i32, i32) {
    %c0_i32 = arith.constant 0 : i32
    %c0_i32_0 = arith.constant 0 : i32
    %c0_i32_1 = arith.constant 0 : i32
    return %c0_i32, %c0_i32_0 : i32, i32
  }
  func.func @transform_6(%arg0: i32) -> (i32, i32) {
    %c0_i32 = arith.constant 0 : i32
    %c0_i32_0 = arith.constant 0 : i32
    %c0_i32_1 = arith.constant 0 : i32
    return %c0_i32, %c0_i32_0 : i32, i32
  }
  func.func @transform_7(%arg0: i32) -> (i32, i32) {
    %c0_i32 = arith.constant 0 : i32
    %c0_i32_0 = arith.constant 0 : i32
    return %arg0, %c0_i32 : i32, i32
  }
}

module attributes {stable_mosaic.version = 11 : i64} {
  func.func @_mlp_kernel(%arg0: i32, %arg1: memref<16x1024xbf16, #tpu.memory_space<vmem>>, %arg2: memref<1024x128xbf16, #tpu.memory_space<vmem>>, %arg3: memref<1x128xf32, #tpu.memory_space<vmem>>, %arg4: memref<128x128xbf16, #tpu.memory_space<vmem>>, %arg5: memref<1x128xf32, #tpu.memory_space<vmem>>, %arg6: memref<128x128xbf16, #tpu.memory_space<vmem>>, %arg7: memref<1x128xf32, #tpu.memory_space<vmem>>, %arg8: memref<16x128xf32, #tpu.memory_space<vmem>>) attributes {dimension_semantics = [#tpu.dimension_semantics<parallel>], iteration_bounds = array<i64: 1>, scalar_prefetch = 0 : i64, scratch_operands = 0 : i64, tpu.core_type = #tpu.core_type<tc>, window_params = [{transform_indices = @transform_0, window_bounds = array<i64: 16, 1024>}, {pipeline_mode = #tpu.pipeline_mode<synchronous>, transform_indices = @transform_1, window_bounds = array<i64: 1024, 128>}, {pipeline_mode = #tpu.pipeline_mode<synchronous>, transform_indices = @transform_2, window_bounds = array<i64: 1, 128>}, {pipeline_mode = #tpu.pipeline_mode<synchronous>, transform_indices = @transform_3, window_bounds = array<i64: 128, 128>}, {pipeline_mode = #tpu.pipeline_mode<synchronous>, transform_indices = @transform_4, window_bounds = array<i64: 1, 128>}, {pipeline_mode = #tpu.pipeline_mode<synchronous>, transform_indices = @transform_5, window_bounds = array<i64: 128, 128>}, {pipeline_mode = #tpu.pipeline_mode<synchronous>, transform_indices = @transform_6, window_bounds = array<i64: 1, 128>}, {transform_indices = @transform_7, window_bounds = array<i64: 16, 128>}]} {
    %c0 = arith.constant 0 : index
    %c0_0 = arith.constant 0 : index
    %0 = vector.load %arg1[%c0, %c0_0] : memref<16x1024xbf16, #tpu.memory_space<vmem>>, vector<16x1024xbf16>
    %c0_1 = arith.constant 0 : index
    %c0_2 = arith.constant 0 : index
    %1 = vector.load %arg2[%c0_1, %c0_2] : memref<1024x128xbf16, #tpu.memory_space<vmem>>, vector<1024x128xbf16>
    %c0_3 = arith.constant 0 : index
    %c0_4 = arith.constant 0 : index
    %2 = vector.load %arg3[%c0_3, %c0_4] : memref<1x128xf32, #tpu.memory_space<vmem>>, vector<1x128xf32>
    %cst = arith.constant dense<0.000000e+00> : vector<16x128xf32>
    %3 = tpu.matmul %0, %1, %cst {dimension_numbers = #tpu.dot_dimension_numbers<[1], [0], [0], [1], [0, 0, 1, 1], [], []>} : vector<16x1024xbf16>, vector<1024x128xbf16>, vector<16x128xf32> -> vector<16x128xf32>
    %4 = vector.broadcast %2 : vector<1x128xf32> to vector<16x128xf32>
    %5 = arith.addf %3, %4 : vector<16x128xf32>
    %cst_5 = arith.constant 0.000000e+00 : f32
    %6 = vector.broadcast %cst_5 : f32 to vector<16x128xf32>
    %7 = arith.maximumf %5, %6 : vector<16x128xf32>
    %c0_6 = arith.constant 0 : index
    %c0_7 = arith.constant 0 : index
    %8 = vector.load %arg4[%c0_6, %c0_7] : memref<128x128xbf16, #tpu.memory_space<vmem>>, vector<128x128xbf16>
    %c0_8 = arith.constant 0 : index
    %c0_9 = arith.constant 0 : index
    %9 = vector.load %arg5[%c0_8, %c0_9] : memref<1x128xf32, #tpu.memory_space<vmem>>, vector<1x128xf32>
    %10 = arith.truncf %7 : vector<16x128xf32> to vector<16x128xbf16>
    %cst_10 = arith.constant dense<0.000000e+00> : vector<16x128xf32>
    %11 = tpu.matmul %10, %8, %cst_10 {dimension_numbers = #tpu.dot_dimension_numbers<[1], [0], [0], [1], [0, 0, 1, 1], [], []>} : vector<16x128xbf16>, vector<128x128xbf16>, vector<16x128xf32> -> vector<16x128xf32>
    %12 = vector.broadcast %9 : vector<1x128xf32> to vector<16x128xf32>
    %13 = arith.addf %11, %12 : vector<16x128xf32>
    %cst_11 = arith.constant 0.000000e+00 : f32
    %14 = vector.broadcast %cst_11 : f32 to vector<16x128xf32>
    %15 = arith.maximumf %13, %14 : vector<16x128xf32>
    %c0_12 = arith.constant 0 : index
    %c0_13 = arith.constant 0 : index
    %16 = vector.load %arg6[%c0_12, %c0_13] : memref<128x128xbf16, #tpu.memory_space<vmem>>, vector<128x128xbf16>
    %c0_14 = arith.constant 0 : index
    %c0_15 = arith.constant 0 : index
    %17 = vector.load %arg7[%c0_14, %c0_15] : memref<1x128xf32, #tpu.memory_space<vmem>>, vector<1x128xf32>
    %18 = arith.truncf %15 : vector<16x128xf32> to vector<16x128xbf16>
    %cst_16 = arith.constant dense<0.000000e+00> : vector<16x128xf32>
    %19 = tpu.matmul %18, %16, %cst_16 {dimension_numbers = #tpu.dot_dimension_numbers<[1], [0], [0], [1], [0, 0, 1, 1], [], []>} : vector<16x128xbf16>, vector<128x128xbf16>, vector<16x128xf32> -> vector<16x128xf32>
    %20 = vector.broadcast %17 : vector<1x128xf32> to vector<16x128xf32>
    %21 = arith.addf %19, %20 : vector<16x128xf32>
    %c0_17 = arith.constant 0 : index
    %c0_18 = arith.constant 0 : index
    %22 = vector.load %arg8[%c0_17, %c0_18] : memref<16x128xf32, #tpu.memory_space<vmem>>, vector<16x128xf32>
    tpu.vector_store %arg8[%c0_17, %c0_18], %21 {strides = array<i32>} : memref<16x128xf32, #tpu.memory_space<vmem>>, vector<16x128xf32>,
    return
  }
  func.func @transform_0(%arg0: i32) -> (i32, i32) {
    %c0_i32 = arith.constant 0 : i32
    %c0_i32_0 = arith.constant 0 : i32
    return %arg0, %c0_i32 : i32, i32
  }
  func.func @transform_1(%arg0: i32) -> (i32, i32) {
    %c0_i32 = arith.constant 0 : i32
    %c0_i32_0 = arith.constant 0 : i32
    %c0_i32_1 = arith.constant 0 : i32
    return %c0_i32, %c0_i32_0 : i32, i32
  }
  func.func @transform_2(%arg0: i32) -> (i32, i32) {
    %c0_i32 = arith.constant 0 : i32
    %c0_i32_0 = arith.constant 0 : i32
    %c0_i32_1 = arith.constant 0 : i32
    return %c0_i32, %c0_i32_0 : i32, i32
  }
  func.func @transform_3(%arg0: i32) -> (i32, i32) {
    %c0_i32 = arith.constant 0 : i32
    %c0_i32_0 = arith.constant 0 : i32
    %c0_i32_1 = arith.constant 0 : i32
    return %c0_i32, %c0_i32_0 : i32, i32
  }
  func.func @transform_4(%arg0: i32) -> (i32, i32) {
    %c0_i32 = arith.constant 0 : i32
    %c0_i32_0 = arith.constant 0 : i32
    %c0_i32_1 = arith.constant 0 : i32
    return %c0_i32, %c0_i32_0 : i32, i32
  }
  func.func @transform_5(%arg0: i32) -> (i32, i32) {
    %c0_i32 = arith.constant 0 : i32
    %c0_i32_0 = arith.constant 0 : i32
    %c0_i32_1 = arith.constant 0 : i32
    return %c0_i32, %c0_i32_0 : i32, i32
  }
  func.func @transform_6(%arg0: i32) -> (i32, i32) {
    %c0_i32 = arith.constant 0 : i32
    %c0_i32_0 = arith.constant 0 : i32
    %c0_i32_1 = arith.constant 0 : i32
    return %c0_i32, %c0_i32_0 : i32, i32
  }
  func.func @transform_7(%arg0: i32) -> (i32, i32) {
    %c0_i32 = arith.constant 0 : i32
    %c0_i32_0 = arith.constant 0 : i32
    return %arg0, %c0_i32 : i32, i32
  }
}

</mosaic_0001>

<bundles_post_ra>
// kernel: tpu_custom_call.1
= control target key start
LH: loop header
LB: loop body
LE: loop exit
PB: predicated region body
PF: predicated region fallthrough
CT: control target
= control target key end

     0   :  { %12 = vsyncpa [#allocation3], 0  ;;  %s1607_s0 = inlined_call_operand.hbm [shape: bf16[16,1024], index: 0, kind: input, shape index: {}]   ;;  %s1608_s1 = inlined_call_operand.hbm [shape: bf16[1024,128], index: 1, kind: input, shape index: {}]   ;;  %s1609_s2 = inlined_call_operand.vmem [shape: f32[1,128], index: 2, kind: input, shape index: {}]   ;;  %s1610_s3 = inlined_call_operand.hbm [shape: bf16[128,128], index: 3, kind: input, shape index: {}]   ;;  %s1611_s4 = inlined_call_operand.vmem [shape: f32[1,128], index: 4, kind: input, shape index: {}]   ;;  %s1612_s5 = inlined_call_operand.hbm [shape: bf16[128,128], index: 5, kind: input, shape index: {}]   ;;  %s1613_s6 = inlined_call_operand.vmem [shape: f32[1,128], index: 6, kind: input, shape index: {}]   ;;  %s1614_s7 = inlined_call_operand.hbm [shape: f32[16,128], index: 7, kind: output, shape index: {}]  }
   0x1   :  { %13 = vsyncpa [#allocation6], 0 }
   0x2   :  { %14 = vsyncpa [#allocation9], 0 }
   0x3   :  { %15 = vsyncpa [#allocation4], 0  ;;  %s1503_s24 = smov [#allocation5]  }
   0x4   :  { %s33_s25 = sshll.u32 %s1503_s24, 4  ;;  %s34_s25 = int_to_ptr.vmem [resolvable:$true] %s33_s25 }
   0x5   :  { %s1403_s26 = scalar_lea.vmem %s34_s25, 8192  ;;  %p1408_p1 = scmp.lt.s32.totalorder %s34_s25, %s34_s25 }
   0x6   :  { %p1404_p0 = scmp.ne.s32.totalorder %s34_s25, %s1403_s26  ;;  %p1409_p2 = scmp.lt.s32.totalorder %s1403_s26, %s1403_s26 }
   0x8   :  { %p1410_p3 = por %p1409_p2, %p1408_p1 }
   0xa   :  { %p1411_p4 = pnand %p1410_p3, %p1404_p0 }
   0xc   :  { %1414 = shalt.err (!%p1411_p4)
}
   0xd   :  { %s1504_s27 = smov 64   ;;  %s1505_s28 = smov 4  }
   0xe   :  { %39 = dma.hbm_to_vmem [thread:$0]  %s1608_s1, 8192, %s34_s25, [#allocation6], %s1504_s27, %s1504_s27, %s1505_s28  }
   0xf   :  { %s1506_s8 = smov [#allocation2]  }
  0x10   :  { %s21_s9 = sshll.u32 %s1506_s8, 4  ;;  %s22_s9 = int_to_ptr.vmem [resolvable:$true] %s21_s9 }
  0x11   :  { %s1423_s10 = scalar_lea.vmem %s22_s9, 1024  ;;  %p1428_p6 = scmp.lt.s32.totalorder %s22_s9, %s22_s9 }
  0x12   :  { %p1424_p5 = scmp.ne.s32.totalorder %s22_s9, %s1423_s10  ;;  %p1429_p7 = scmp.lt.s32.totalorder %s1423_s10, %s1423_s10 }
  0x14   :  { %p1430_p8 = por %p1429_p7, %p1428_p6 }
  0x16   :  { %p1431_p9 = pnand %p1430_p8, %p1424_p5 }
  0x18   :  { %1434 = shalt.err (!%p1431_p9)
}
  0x19   :  { %s1507_s11 = smov 512   ;;  %s1508_s12 = smov 32  }
  0x1a   :  { %27 = dma.hbm_to_vmem [thread:$0]  %s1607_s0, 1024, %s22_s9, [#allocation3], %s1507_s11, %s1507_s11, %s1508_s12  }
  0x1b   :  { %s1509_s15 = smov [#allocation7]   ;;  %s1510_s17 = smov [#allocation8]  }
  0x1c   :  { %s47_s16 = sshll.u32 %s1509_s15, 4  ;;  %s61_s1 = sshll.u32 %s1510_s17, 4  ;;  %s48_s16 = int_to_ptr.vmem [resolvable:$true] %s47_s16  ;;  %s62_s1 = int_to_ptr.vmem [resolvable:$true] %s61_s1 }
  0x1d   :  { %s1443_s18 = scalar_lea.vmem %s48_s16, 1024  ;;  %p1448_p11 = scmp.lt.s32.totalorder %s48_s16, %s48_s16 }
  0x1e   :  { %p1444_p10 = scmp.ne.s32.totalorder %s48_s16, %s1443_s18  ;;  %p1449_p12 = scmp.lt.s32.totalorder %s1443_s18, %s1443_s18 }
  0x20   :  { %p1450_p13 = por %p1449_p12, %p1448_p11 }
  0x22   :  { %p1451_p0 = pnand %p1450_p13, %p1444_p10 }
  0x24   :  { %1454 = shalt.err (!%p1451_p0)
}
  0x25   :  { %53 = dma.hbm_to_vmem [thread:$0]  %s1610_s3, 1024, %s48_s16, [#allocation6], %s1504_s27, %s1504_s27, %s1505_s28  }
  0x26   :  { %s1463_s0 = scalar_lea.vmem %s62_s1, 1024  ;;  %p1468_p2 = scmp.lt.s32.totalorder %s62_s1, %s62_s1 }
  0x27   :  { %p1464_p1 = scmp.ne.s32.totalorder %s62_s1, %s1463_s0  ;;  %p1469_p3 = scmp.lt.s32.totalorder %s1463_s0, %s1463_s0 }
  0x29   :  { %p1470_p4 = por %p1469_p3, %p1468_p2 }
  0x2b   :  { %p1471_p5 = pnand %p1470_p4, %p1464_p1 }
  0x2d   :  { %1474 = shalt.err (!%p1471_p5)
}
  0x2e   :  { %67 = dma.hbm_to_vmem [thread:$0]  %s1612_s5, 1024, %s62_s1, [#allocation9], %s1504_s27, %s1504_s27, %s1505_s28  }
  0x2f   :  { %1495 = dma.done.wait [#allocation3], 1024  }
  0x30   :  { %1496 = vsyncadd [#allocation3], 4294966272 }
  0x31   :  { %1497 = dma.done.wait [#allocation6], 9216  }
  0x32   :  { %1498 = vsyncadd [#allocation6], 4294958080 }
  0x33   :  { %1499 = dma.done.wait [#allocation9], 1024  }
  0x34   :  { %1500 = vsyncadd [#allocation9], 4294966272  ;;  %v1315_v0 = vld [vmem:[#allocation5 + $0x78] sm:$0xff]   ;;  %v1319_v4 = vld [vmem:[#allocation5 + $0x70] sm:$0xff]   ;;  %vm1512_vm0 = vmmov 0   ;;  %s1513_s26 = smov [#allocation10]  }
  0x35   :  { %v1316_v1 = vld [vmem:[#allocation5 + $0xf8] sm:$0xff]   ;;  %1156 = vmatprep.subr.bf16.mxu0 %v1315_v0  ;;  %v1320_v5 = vld [vmem:[#allocation5 + $0xf0] sm:$0xff]   ;;  %v1323_v8 = vld [vmem:[#allocation5 + $0x68] sm:$0xff]   ;;  %s1051_s27 = sshll.u32 %s1513_s26, 4  ;;  %s1052_s27 = int_to_ptr.vmem [resolvable:$true] %s1051_s27 }
  0x36   :  { %v1317_v2 = vld [vmem:[#allocation5 + $0x38] sm:$0xff]   ;;  %1178 = vmatprep.subr.bf16.mxu1 %v1316_v1  ;;  %v1321_v6 = vld [vmem:[#allocation5 + $0x30] sm:$0xff]   ;;  %v1324_v9 = vld [vmem:[#allocation5 + $0xe8] sm:$0xff]   ;;  %p1480_p7 = scmp.lt.s32.totalorder %s1052_s27, %s1052_s27 }
  0x37   :  { %v1318_v3 = vld [vmem:[#allocation5 + $0xb8] sm:$0xff]   ;;  %1157 = vmatpush3.bf16.msra.mxu0 %v1317_v2  ;;  %v1322_v7 = vld [vmem:[#allocation5 + $0xb0] sm:$0xff]   ;;  %v1325_v10 = vld [vmem:[#allocation5 + $0x28] sm:$0xff]  }
  0x38   :  { %1179 = vmatpush3.bf16.msra.mxu1 %v1318_v3  ;;  %1158 = vmatprep.subr.bf16.mxu0 %v1319_v4  ;;  %v1326_v11 = vld [vmem:[#allocation5 + $0xa8] sm:$0xff]   ;;  %v1327_v12 = vld [vmem:[#allocation5 + $0x60] sm:$0xff]   ;;  %v1331_v16 = vld [vmem:[#allocation5 + $0x58] sm:$0xff]  }
  0x39   :  { %1180 = vmatprep.subr.bf16.mxu1 %v1320_v5  ;;  %v1328_v13 = vld [vmem:[#allocation5 + $0xe0] sm:$0xff]   ;;  %v1332_v17 = vld [vmem:[#allocation5 + $0xd8] sm:$0xff]   ;;  %v1335_v20 = vld [vmem:[#allocation5 + $0x50] sm:$0xff]  }
  0x3a   :  { %v1329_v14 = vld [vmem:[#allocation5 + $0x20] sm:$0xff]   ;;  %v1333_v18 = vld [vmem:[#allocation5 + $0x18] sm:$0xff]   ;;  %v1336_v21 = vld [vmem:[#allocation5 + $0xd0] sm:$0xff]  }
  0x3b   :  { %1159 = vmatpush3.bf16.msra.mxu0 %v1321_v6  ;;  %v1330_v15 = vld [vmem:[#allocation5 + $0xa0] sm:$0xff]   ;;  %v1334_v19 = vld [vmem:[#allocation5 + $0x98] sm:$0xff]   ;;  %v1337_v22 = vld [vmem:[#allocation5 + $0x10] sm:$0xff]  }
  0x3c   :  { %1181 = vmatpush3.bf16.msra.mxu1 %v1322_v7  ;;  %1160 = vmatprep.subr.bf16.mxu0 %v1323_v8  ;;  %v1338_v23 = vld [vmem:[#allocation5 + $0x90] sm:$0xff]   ;;  %v1339_v24 = vld [vmem:[#allocation5 + $0x48] sm:$0xff]   ;;  %v1343_v28 = vld [vmem:[#allocation5 + $0x40] sm:$0xff]  }
  0x3d   :  { %1182 = vmatprep.subr.bf16.mxu1 %v1324_v9  ;;  %v1340_v25 = vld [vmem:[#allocation5 + $0xc8] sm:$0xff]   ;;  %v1344_v29 = vld [vmem:[#allocation5 + $0xc0] sm:$0xff]   ;;  %v1347_v40 = vld [vmem:[#allocation5 + $0x178] sm:$0xff]  }
  0x3e   :  { %v1341_v26 = vld [vmem:[#allocation5 + $0x8] sm:$0xff]   ;;  %v1345_v30 = vld [vmem:[#allocation5] sm:$0xff]   ;;  %v1348_v41 = vld [vmem:[#allocation5 + $0x1f8] sm:$0xff]  }
  0x3f   :  { %1161 = vmatpush3.bf16.msra.mxu0 %v1325_v10  ;;  %v1342_v27 = vld [vmem:[#allocation5 + $0x88] sm:$0xff]   ;;  %v1346_v31 = vld [vmem:[#allocation5 + $0x80] sm:$0xff]   ;;  %v1349_v42 = vld [vmem:[#allocation5 + $0x138] sm:$0xff]  }
  0x40   :  { %1183 = vmatpush3.bf16.msra.mxu1 %v1326_v11  ;;  %1162 = vmatprep.subr.bf16.mxu0 %v1327_v12  ;;  %v83_v32 = vld [vmem:[#allocation2] sm:$0xff]  ;;  %v84_v34 = vld [vmem:[#allocation2 + $0x8] sm:$0xff]  ;;  %v1350_v43 = vld [vmem:[#allocation5 + $0x1b8] sm:$0xff]  }
  0x41   :  { %1184 = vmatprep.subr.bf16.mxu1 %v1328_v13  ;;  %v87_v33 = vld [vmem:[#allocation2 + $0x20] sm:$0xff]  ;;  %v88_v37 = vld [vmem:[#allocation2 + $0x28] sm:$0xff]  ;;  %v1351_v44 = vld [vmem:[#allocation5 + $0x170] sm:$0xff]  }
  0x42   :  { %v1066_v35 = vcombine.low %v83_v32, %v87_v33  ;;  %v1067_v36 = vcombine.high %v83_v32, %v87_v33  ;;  %v1068_v38 = vcombine.low %v84_v34, %v88_v37  ;;  %v1069_v39 = vcombine.high %v84_v34, %v88_v37  ;;  %v1352_v45 = vld [vmem:[#allocation5 + $0x1f0] sm:$0xff]   ;;  %v1355_v48 = vld [vmem:[#allocation5 + $0x168] sm:$0xff]   ;;  %v1359_v52 = vld [vmem:[#allocation5 + $0x160] sm:$0xff]  }
  0x43   :  { %1163 = vmatpush3.bf16.msra.mxu0 %v1329_v14  ;;  %v1353_v46 = vld [vmem:[#allocation5 + $0x130] sm:$0xff]   ;;  %v1356_v49 = vld [vmem:[#allocation5 + $0x1e8] sm:$0xff]   ;;  %v1360_v53 = vld [vmem:[#allocation5 + $0x1e0] sm:$0xff]  }
  0x44   :  { %1185 = vmatpush3.bf16.msra.mxu1 %v1330_v15  ;;  %1164 = vmatprep.subr.bf16.mxu0 %v1331_v16  ;;  %v1354_v47 = vld [vmem:[#allocation5 + $0x1b0] sm:$0xff]   ;;  %v1357_v50 = vld [vmem:[#allocation5 + $0x128] sm:$0xff]   ;;  %v1361_v54 = vld [vmem:[#allocation5 + $0x120] sm:$0xff]  }
  0x45   :  { %1186 = vmatprep.subr.bf16.mxu1 %v1332_v17  ;;  %682 = vmatprep.mubr.bf16.mxu0 %v1067_v36  ;;  %v1358_v51 = vld [vmem:[#allocation5 + $0x1a8] sm:$0xff]   ;;  %v1362_v55 = vld [vmem:[#allocation5 + $0x1a0] sm:$0xff]   ;;  %v1363_v56 = vld [vmem:[#allocation5 + $0x158] sm:$0xff]   ;;  %v1511_v17 = vmov 0.0  }
  0x46   :  { %723 = vmatprep.mubr.bf16.mxu1 %v1069_v39  ;;  %v1364_v57 = vld [vmem:[#allocation5 + $0x1d8] sm:$0xff]   ;;  %v1367_v60 = vld [vmem:[#allocation5 + $0x150] sm:$0xff]   ;;  %v1371_v0 = vld [vmem:[#allocation5 + $0x148] sm:$0xff]  }
  0x47   :  { %1165 = vmatpush3.bf16.msra.mxu0 %v1333_v18  ;;  %v1365_v58 = vld [vmem:[#allocation5 + $0x118] sm:$0xff]   ;;  %v1368_v61 = vld [vmem:[#allocation5 + $0x1d0] sm:$0xff]   ;;  %v1372_v1 = vld [vmem:[#allocation5 + $0x1c8] sm:$0xff]  }
  0x48   :  { %1187 = vmatpush3.bf16.msra.mxu1 %v1334_v19  ;;  %1166 = vmatprep.subr.bf16.mxu0 %v1335_v20  ;;  %v1366_v59 = vld [vmem:[#allocation5 + $0x198] sm:$0xff]   ;;  %v1369_v62 = vld [vmem:[#allocation5 + $0x110] sm:$0xff]   ;;  %v1373_v2 = vld [vmem:[#allocation5 + $0x108] sm:$0xff]  }
  0x49   :  { %1188 = vmatprep.subr.bf16.mxu1 %v1336_v21  ;;  %v1370_v63 = vld [vmem:[#allocation5 + $0x190] sm:$0xff]   ;;  %v1374_v3 = vld [vmem:[#allocation5 + $0x188] sm:$0xff]   ;;  %v1375_v4 = vld [vmem:[#allocation5 + $0x140] sm:$0xff]  }
  0x4a   :  { %v1376_v5 = vld [vmem:[#allocation5 + $0x1c0] sm:$0xff]   ;;  %v85_v8 = vld [vmem:[#allocation2 + $0x10] sm:$0xff]  ;;  %v86_v12 = vld [vmem:[#allocation2 + $0x18] sm:$0xff] }
  0x4b   :  { %1167 = vmatpush3.bf16.msra.mxu0 %v1337_v22  ;;  %v1377_v6 = vld [vmem:[#allocation5 + $0x100] sm:$0xff]   ;;  %v89_v9 = vld [vmem:[#allocation2 + $0x30] sm:$0xff]  ;;  %v90_v13 = vld [vmem:[#allocation2 + $0x38] sm:$0xff] }
  0x4c   :  { %1189 = vmatpush3.bf16.msra.mxu1 %v1338_v23  ;;  %1168 = vmatprep.subr.bf16.mxu0 %v1339_v24  ;;  %v1378_v7 = vld [vmem:[#allocation5 + $0x180] sm:$0xff]   ;;  %v1070_v10 = vcombine.low %v85_v8, %v89_v9  ;;  %v1071_v11 = vcombine.high %v85_v8, %v89_v9  ;;  %v1072_v14 = vcombine.low %v86_v12, %v90_v13  ;;  %v1379_v16 = vld [vmem:[#allocation7 + $0x38] sm:$0xff]   ;;  %v1380_v18 = vld [vmem:[#allocation7 + $0x30] sm:$0xff]  }
  0x4d   :  { %1190 = vmatprep.subr.bf16.mxu1 %v1340_v25  ;;  %v1073_v15 = vcombine.high %v86_v12, %v90_v13  ;;  %v1381_v19 = vld [vmem:[#allocation7 + $0x28] sm:$0xff]   ;;  %v1382_v20 = vld [vmem:[#allocation7 + $0x20] sm:$0xff]   ;;  %v1383_v21 = vld [vmem:[#allocation7 + $0x18] sm:$0xff]  }
  0x4e   :  { %v1384_v22 = vld [vmem:[#allocation7 + $0x10] sm:$0xff]   ;;  %v1385_v23 = vld [vmem:[#allocation7 + $0x8] sm:$0xff]   ;;  %v1386_v24 = vld [vmem:[#allocation7] sm:$0xff]  }
  0x4f   :  { %1169 = vmatpush3.bf16.msra.mxu0 %v1341_v26  ;;  %v1387_v25 = vld [vmem:[#allocation8 + $0x38] sm:$0xff]   ;;  %v1388_v26 = vld [vmem:[#allocation8 + $0x30] sm:$0xff]   ;;  %v1065_v37 = vld [vmem:[%s1609_s2] ss:$0 sm:$0xff] }
  0x50   :  { %1191 = vmatpush3.bf16.msra.mxu1 %v1342_v27  ;;  %1170 = vmatprep.subr.bf16.mxu0 %v1343_v28  ;;  %v1389_v27 = vld [vmem:[#allocation8 + $0x28] sm:$0xff]   ;;  %v1390_v28 = vld [vmem:[#allocation8 + $0x20] sm:$0xff]  }
  0x51   :  { %1192 = vmatprep.subr.bf16.mxu1 %v1344_v29  ;;  %v1391_v29 = vld [vmem:[#allocation8 + $0x18] sm:$0xff]  }
  0x53   :  { %1171 = vmatpush3.bf16.msra.mxu0 %v1345_v30 }
  0x54   :  { %1193 = vmatpush3.bf16.msra.mxu1 %v1346_v31  ;;  %1200 = vmatprep.subr.bf16.mxu0 %v1347_v40 }
  0x55   :  { %1222 = vmatprep.subr.bf16.mxu1 %v1348_v41 }
  0x56   :  { %683 = vmatmul.mubr.bf16.vlgmr.msra.gmra.mxu0 %v1066_v35 }
  0x57   :  { %724 = vmatmul.mubr.bf16.vlgmr.msra.gmra.mxu1 %v1068_v38  ;;  %1201 = vmatpush3.bf16.msra.mxu0 %v1349_v42 }
  0x58   :  { %1223 = vmatpush3.bf16.msra.mxu1 %v1350_v43  ;;  %1202 = vmatprep.subr.bf16.mxu0 %v1351_v44 }
  0x59   :  { %1224 = vmatprep.subr.bf16.mxu1 %v1352_v45  ;;  %764 = vmatprep.mubr.bf16.mxu0 %v1071_v11 }
  0x5a   :  { %805 = vmatprep.mubr.bf16.mxu1 %v1073_v15  ;;  %v1147_v15 = vld [vmem:[%s1613_s6] ss:$0 sm:$0xff] }
  0x5b   :  { %1203 = vmatpush3.bf16.msra.mxu0 %v1353_v46 }
  0x5c   :  { %1225 = vmatpush3.bf16.msra.mxu1 %v1354_v47  ;;  %1204 = vmatprep.subr.bf16.mxu0 %v1355_v48 }
  0x5d   :  { %1226 = vmatprep.subr.bf16.mxu1 %v1356_v49 }
  0x5f   :  { %1205 = vmatpush3.bf16.msra.mxu0 %v1357_v50 }
  0x60   :  { %1227 = vmatpush3.bf16.msra.mxu1 %v1358_v51  ;;  %1206 = vmatprep.subr.bf16.mxu0 %v1359_v52 }
  0x61   :  { %1228 = vmatprep.subr.bf16.mxu1 %v1360_v53 }
  0x63   :  { %1207 = vmatpush3.bf16.msra.mxu0 %v1361_v54 }
  0x64   :  { %1229 = vmatpush3.bf16.msra.mxu1 %v1362_v55  ;;  %1208 = vmatprep.subr.bf16.mxu0 %v1363_v56 }
  0x65   :  { %1230 = vmatprep.subr.bf16.mxu1 %v1364_v57 }
  0x67   :  { %1209 = vmatpush3.bf16.msra.mxu0 %v1365_v58 }
  0x68   :  { %1231 = vmatpush3.bf16.msra.mxu1 %v1366_v59  ;;  %1210 = vmatprep.subr.bf16.mxu0 %v1367_v60 }
  0x69   :  { %1232 = vmatprep.subr.bf16.mxu1 %v1368_v61 }
  0x6b   :  { %1211 = vmatpush3.bf16.msra.mxu0 %v1369_v62 }
  0x6c   :  { %1233 = vmatpush3.bf16.msra.mxu1 %v1370_v63  ;;  %1212 = vmatprep.subr.bf16.mxu0 %v1371_v0 }
  0x6d   :  { %1234 = vmatprep.subr.bf16.mxu1 %v1372_v1 }
  0x6f   :  { %1213 = vmatpush3.bf16.msra.mxu0 %v1373_v2  ;;  %v1392_v2 = vld [vmem:[#allocation8 + $0x10] sm:$0xff]  }
  0x70   :  { %1235 = vmatpush3.bf16.msra.mxu1 %v1374_v3  ;;  %1214 = vmatprep.subr.bf16.mxu0 %v1375_v4  ;;  %v1393_v3 = vld [vmem:[#allocation8 + $0x8] sm:$0xff]   ;;  %v1394_v4 = vld [vmem:[#allocation8] sm:$0xff]  }
  0x71   :  { %1236 = vmatprep.subr.bf16.mxu1 %v1376_v5  ;;  %v1138_v5 = vld [vmem:[%s1611_s4] ss:$0 sm:$0xff]  ;;  %s1475_s4 = scalar_lea.vmem %s1052_s27, 256 }
  0x72   :  { %p1476_p6 = scmp.ne.s32.totalorder %s1052_s27, %s1475_s4  ;;  %p1481_p8 = scmp.lt.s32.totalorder %s1475_s4, %s1475_s4 }
  0x73   :  { %1215 = vmatpush3.bf16.msra.mxu0 %v1377_v6 }
  0x74   :  { %1237 = vmatpush3.bf16.msra.mxu1 %v1378_v7  ;;  %1262 = vmatprep.subr.bf16.mxu0 %v1511_v17  ;;  %p1482_p9 = por %p1481_p8, %p1480_p7 }
  0x75   :  { %1282 = vmatprep.subr.bf16.mxu1 %v1511_v17 }
  0x76   :  { %765 = vmatmul.mubr.bf16.vlgmr.msra.gmra.mxu0 %v1070_v10  ;;  %p1483_p10 = pnand %p1482_p9, %p1476_p6 }
  0x77   :  { %806 = vmatmul.mubr.bf16.vlgmr.msra.gmra.mxu1 %v1072_v14  ;;  %1263 = vmatpush3.bf16.msra.mxu0 %v1379_v16 }
  0x78   :  { %1264 = vmatprep.subr.bf16.mxu0 %v1511_v17  ;;  %1278 = vmatprep.mubr.msk.bf16.mxu0 %vm1512_vm0, %v1511_v17 }
  0x79   :  { %1298 = vmatprep.mubr.msk.bf16.mxu1 %vm1512_vm0, %v1511_v17  ;;  %1283 = vmatpush3.bf16.msra.mxu1 %v1387_v25 }
  0x7a   :  { %1284 = vmatprep.subr.bf16.mxu1 %v1511_v17 }
  0x7b   :  { %1265 = vmatpush3.bf16.msra.mxu0 %v1380_v18 }
  0x7c   :  { %1266 = vmatprep.subr.bf16.mxu0 %v1511_v17 }
  0x7d   :  { %1285 = vmatpush3.bf16.msra.mxu1 %v1388_v26 }
  0x7e   :  { %1286 = vmatprep.subr.bf16.mxu1 %v1511_v17 }
  0x7f   :  { %1267 = vmatpush3.bf16.msra.mxu0 %v1381_v19 }
  0x80   :  { %1268 = vmatprep.subr.bf16.mxu0 %v1511_v17 }
  0x81   :  { %1287 = vmatpush3.bf16.msra.mxu1 %v1389_v27 }
  0x82   :  { %1288 = vmatprep.subr.bf16.mxu1 %v1511_v17 }
  0x83   :  { %1269 = vmatpush3.bf16.msra.mxu0 %v1382_v20 }
  0x84   :  { %1270 = vmatprep.subr.bf16.mxu0 %v1511_v17 }
  0x85   :  { %1289 = vmatpush3.bf16.msra.mxu1 %v1390_v28 }
  0x86   :  { %1290 = vmatprep.subr.bf16.mxu1 %v1511_v17 }
  0x87   :  { %1271 = vmatpush3.bf16.msra.mxu0 %v1383_v21 }
  0x88   :  { %1272 = vmatprep.subr.bf16.mxu0 %v1511_v17 }
  0x89   :  { %1291 = vmatpush3.bf16.msra.mxu1 %v1391_v29 }
  0x8a   :  { %1292 = vmatprep.subr.bf16.mxu1 %v1511_v17 }
  0x8b   :  { %1273 = vmatpush3.bf16.msra.mxu0 %v1384_v22 }
  0x8c   :  { %1274 = vmatprep.subr.bf16.mxu0 %v1511_v17 }
  0x8d   :  { %1293 = vmatpush3.bf16.msra.mxu1 %v1392_v2 }
  0x8e   :  { %1294 = vmatprep.subr.bf16.mxu1 %v1511_v17 }
  0x8f   :  { %1275 = vmatpush3.bf16.msra.mxu0 %v1385_v23 }
  0x90   :  { %1276 = vmatprep.subr.bf16.mxu0 %v1511_v17 }
  0x91   :  { %1295 = vmatpush3.bf16.msra.mxu1 %v1393_v3 }
  0x92   :  { %1296 = vmatprep.subr.bf16.mxu1 %v1511_v17 }
  0x93   :  { %1277 = vmatpush3.bf16.msra.mxu0 %v1386_v24 }
  0x95   :  { %1297 = vmatpush3.bf16.msra.mxu1 %v1394_v4 }
 0x116   :  { %v1172_v30 = vpop.f32.mrf.mxu0 }
 0x117   :  { %v1194_v31 = vpop.f32.mrf.mxu1 }
 0x118   :  { %v1173_v32 = vpop.f32.mrf.mxu0 }
 0x119   :  { %v1195_v33 = vpop.f32.mrf.mxu1  ;;  %v1174_v35 = vadd.f32 %v1173_v32, %v1172_v30 }
 0x11a   :  { %v1175_v34 = vpop.f32.mrf.mxu0  ;;  %v1196_v40 = vadd.f32 %v1195_v33, %v1194_v31 }
 0x11b   :  { %v1197_v36 = vpop.f32.mrf.mxu1  ;;  %v685_v39 = vadd.f32 %v1174_v35, %v1065_v37 }
 0x11c   :  { %v1176_v38 = vpop.f32.mrf.mxu0 }
 0x11d   :  { %v1177_v41 = vadd.f32 %v1176_v38, %v1175_v34  ;;  %v1198_v42 = vpop.f32.mrf.mxu1  ;;  %v726_v46 = vadd.f32 %v1196_v40, %v685_v39 }
 0x11e   :  { %v1199_v51 = vadd.f32 %v1198_v42, %v1197_v36 }
 0x11f   :  { %v688_v47 = vadd.f32 %v1177_v41, %v1065_v37 }
 0x121   :  { %v729_v55 = vadd.f32 %v1199_v51, %v688_v47 }
 0x136   :  { %v1216_v43 = vpop.f32.mrf.mxu0 }
 0x137   :  { %v1238_v44 = vpop.f32.mrf.mxu1 }
 0x138   :  { %v1217_v45 = vpop.f32.mrf.mxu0 }
 0x139   :  { %v1218_v48 = vadd.f32 %v1217_v45, %v1216_v43  ;;  %v1239_v49 = vpop.f32.mrf.mxu1 }
 0x13a   :  { %v1219_v50 = vpop.f32.mrf.mxu0  ;;  %v1240_v56 = vadd.f32 %v1239_v49, %v1238_v44 }
 0x13b   :  { %v767_v52 = vadd.f32 %v1218_v48, %v726_v46  ;;  %v1241_v53 = vpop.f32.mrf.mxu1 }
 0x13c   :  { %v1220_v54 = vpop.f32.mrf.mxu0 }
 0x13d   :  { %v1221_v57 = vadd.f32 %v1220_v54, %v1219_v50  ;;  %v1242_v58 = vpop.f32.mrf.mxu1  ;;  %v808_v59 = vadd.f32 %v1240_v56, %v767_v52 }
 0x13e   :  { %v1243_v61 = vadd.f32 %v1242_v58, %v1241_v53 }
 0x13f   :  { %v770_v60 = vadd.f32 %v1221_v57, %v729_v55  ;;  %v814_v63 = vmax.f32 %v808_v59, 0.0 }
 0x141   :  { %v811_v62 = vadd.f32 %v1243_v61, %v770_v60 }
 0x143   :  { %v815_v0 = vmax.f32 %v811_v62, 0.0 }
 0x145   :  { %v833_v1 = vpack.c.bf16 %v815_v0, %v814_v63 }
 0x147   :  { %1279 = vmatmul.mubr.bf16.vlgmr.msra.gmra.mxu0 %v833_v1 }
 0x207   :  { %v922_v6 = vpop.f32.mrf.mxu0 }
 0x208   :  { %v923_v8 = vadd.f32 %v1138_v5, %v922_v6 }
 0x209   :  { %v1280_v7 = vpop.f32.mrf.mxu0 }
 0x20a   :  { %v929_v12 = vmax.f32 %v923_v8, 0.0 }
 0x20b   :  { %v925_v9 = vpop.f32.mrf.mxu0 }
 0x20c   :  { %v926_v10 = vadd.f32 %v1138_v5, %v925_v9 }
 0x20d   :  { %v1281_v11 = vpop.f32.mrf.mxu0 }
 0x20e   :  { %v930_v13 = vmax.f32 %v926_v10, 0.0 }
 0x210   :  { %v948_v14 = vpack.c.bf16 %v930_v13, %v929_v12 }
 0x212   :  { %1299 = vmatmul.mubr.bf16.vlgmr.msra.gmra.mxu1 %v948_v14 }
 0x2d2   :  { %v1037_v16 = vpop.f32.mrf.mxu1 }
 0x2d3   :  { %v1038_v17 = vadd.f32 %v1147_v15, %v1037_v16 }
 0x2d4   :  { %v1300_v18 = vpop.f32.mrf.mxu1 }
 0x2d5   :  { %1044 = vst [vmem:[#allocation10] sm:$0xff] %v1038_v17 }
 0x2d6   :  { %v1040_v19 = vpop.f32.mrf.mxu1 }
 0x2d7   :  { %v1041_v20 = vadd.f32 %v1147_v15, %v1040_v19 }
 0x2d8   :  { %v1301_v21 = vpop.f32.mrf.mxu1 }
 0x2d9   :  { %1045 = vst [vmem:[#allocation10 + $0x8] sm:$0xff] %v1041_v20 }
 0x2da   :  { %1486 = shalt.err (!%p1483_p10)
}
 0x2db   :  { %s1514_s28 = smov 128   ;;  %s1515_s6 = smov 8  }
 0x2dc   :  { %1057 = dma.vmem_to_hbm [thread:$0]  %s1052_s27, 256, %s1614_s7, [#allocation4], %s1514_s28, %s1514_s28, %s1515_s6  }
 0x2dd   :  { %1501 = dma.done.wait [#allocation4], 256  }
 0x2de   :  { %1502 = vsyncadd [#allocation4], 4294967040 }
 0x2df   :  { %1061 = vsyncpa [#allocation3], 1 }
 0x2e0   :  { %1062 = vsyncpa [#allocation6], 1 }
 0x2e1   :  { %1063 = vsyncpa [#allocation9], 1 }
 0x2e2   :  { %1064 = vsyncpa [#allocation4], 1 }

// kernel: tpu_custom_call.1
= control target key start
LH: loop header
LB: loop body
LE: loop exit
PB: predicated region body
PF: predicated region fallthrough
CT: control target
= control target key end

     0   :  { %12 = vsyncpa [#allocation3], 0  ;;  %s1607_s0 = inlined_call_operand.hbm [shape: bf16[16,1024], index: 0, kind: input, shape index: {}]   ;;  %s1608_s1 = inlined_call_operand.hbm [shape: bf16[1024,128], index: 1, kind: input, shape index: {}]   ;;  %s1609_s2 = inlined_call_operand.vmem [shape: f32[1,128], index: 2, kind: input, shape index: {}]   ;;  %s1610_s3 = inlined_call_operand.hbm [shape: bf16[128,128], index: 3, kind: input, shape index: {}]   ;;  %s1611_s4 = inlined_call_operand.vmem [shape: f32[1,128], index: 4, kind: input, shape index: {}]   ;;  %s1612_s5 = inlined_call_operand.hbm [shape: bf16[128,128], index: 5, kind: input, shape index: {}]   ;;  %s1613_s6 = inlined_call_operand.vmem [shape: f32[1,128], index: 6, kind: input, shape index: {}]   ;;  %s1614_s7 = inlined_call_operand.hbm [shape: f32[16,128], index: 7, kind: output, shape index: {}]  }
   0x1   :  { %13 = vsyncpa [#allocation6], 0 }
   0x2   :  { %14 = vsyncpa [#allocation9], 0 }
   0x3   :  { %15 = vsyncpa [#allocation4], 0  ;;  %s1503_s24 = smov [#allocation5]  }
   0x4   :  { %s33_s25 = sshll.u32 %s1503_s24, 4  ;;  %s34_s25 = int_to_ptr.vmem [resolvable:$true] %s33_s25 }
   0x5   :  { %s1403_s26 = scalar_lea.vmem %s34_s25, 8192  ;;  %p1408_p1 = scmp.lt.s32.totalorder %s34_s25, %s34_s25 }
   0x6   :  { %p1404_p0 = scmp.ne.s32.totalorder %s34_s25, %s1403_s26  ;;  %p1409_p2 = scmp.lt.s32.totalorder %s1403_s26, %s1403_s26 }
   0x8   :  { %p1410_p3 = por %p1409_p2, %p1408_p1 }
   0xa   :  { %p1411_p4 = pnand %p1410_p3, %p1404_p0 }
   0xc   :  { %1414 = shalt.err (!%p1411_p4)
}
   0xd   :  { %s1504_s27 = smov 64   ;;  %s1505_s28 = smov 4  }
   0xe   :  { %39 = dma.hbm_to_vmem [thread:$0]  %s1608_s1, 8192, %s34_s25, [#allocation6], %s1504_s27, %s1504_s27, %s1505_s28  }
   0xf   :  { %s1506_s8 = smov [#allocation2]  }
  0x10   :  { %s21_s9 = sshll.u32 %s1506_s8, 4  ;;  %s22_s9 = int_to_ptr.vmem [resolvable:$true] %s21_s9 }
  0x11   :  { %s1423_s10 = scalar_lea.vmem %s22_s9, 1024  ;;  %p1428_p6 = scmp.lt.s32.totalorder %s22_s9, %s22_s9 }
  0x12   :  { %p1424_p5 = scmp.ne.s32.totalorder %s22_s9, %s1423_s10  ;;  %p1429_p7 = scmp.lt.s32.totalorder %s1423_s10, %s1423_s10 }
  0x14   :  { %p1430_p8 = por %p1429_p7, %p1428_p6 }
  0x16   :  { %p1431_p9 = pnand %p1430_p8, %p1424_p5 }
  0x18   :  { %1434 = shalt.err (!%p1431_p9)
}
  0x19   :  { %s1507_s11 = smov 512   ;;  %s1508_s12 = smov 32  }
  0x1a   :  { %27 = dma.hbm_to_vmem [thread:$0]  %s1607_s0, 1024, %s22_s9, [#allocation3], %s1507_s11, %s1507_s11, %s1508_s12  }
  0x1b   :  { %s1509_s15 = smov [#allocation7]   ;;  %s1510_s17 = smov [#allocation8]  }
  0x1c   :  { %s47_s16 = sshll.u32 %s1509_s15, 4  ;;  %s61_s1 = sshll.u32 %s1510_s17, 4  ;;  %s48_s16 = int_to_ptr.vmem [resolvable:$true] %s47_s16  ;;  %s62_s1 = int_to_ptr.vmem [resolvable:$true] %s61_s1 }
  0x1d   :  { %s1443_s18 = scalar_lea.vmem %s48_s16, 1024  ;;  %p1448_p11 = scmp.lt.s32.totalorder %s48_s16, %s48_s16 }
  0x1e   :  { %p1444_p10 = scmp.ne.s32.totalorder %s48_s16, %s1443_s18  ;;  %p1449_p12 = scmp.lt.s32.totalorder %s1443_s18, %s1443_s18 }
  0x20   :  { %p1450_p13 = por %p1449_p12, %p1448_p11 }
  0x22   :  { %p1451_p0 = pnand %p1450_p13, %p1444_p10 }
  0x24   :  { %1454 = shalt.err (!%p1451_p0)
}
  0x25   :  { %53 = dma.hbm_to_vmem [thread:$0]  %s1610_s3, 1024, %s48_s16, [#allocation6], %s1504_s27, %s1504_s27, %s1505_s28  }
  0x26   :  { %s1463_s0 = scalar_lea.vmem %s62_s1, 1024  ;;  %p1468_p2 = scmp.lt.s32.totalorder %s62_s1, %s62_s1 }
  0x27   :  { %p1464_p1 = scmp.ne.s32.totalorder %s62_s1, %s1463_s0  ;;  %p1469_p3 = scmp.lt.s32.totalorder %s1463_s0, %s1463_s0 }
  0x29   :  { %p1470_p4 = por %p1469_p3, %p1468_p2 }
  0x2b   :  { %p1471_p5 = pnand %p1470_p4, %p1464_p1 }
  0x2d   :  { %1474 = shalt.err (!%p1471_p5)
}
  0x2e   :  { %67 = dma.hbm_to_vmem [thread:$0]  %s1612_s5, 1024, %s62_s1, [#allocation9], %s1504_s27, %s1504_s27, %s1505_s28  }
  0x2f   :  { %1495 = dma.done.wait [#allocation3], 1024  }
  0x30   :  { %1496 = vsyncadd [#allocation3], 4294966272 }
  0x31   :  { %1497 = dma.done.wait [#allocation6], 9216  }
  0x32   :  { %1498 = vsyncadd [#allocation6], 4294958080 }
  0x33   :  { %1499 = dma.done.wait [#allocation9], 1024  }
  0x34   :  { %1500 = vsyncadd [#allocation9], 4294966272  ;;  %v1315_v0 = vld [vmem:[#allocation5 + $0x78] sm:$0xff]   ;;  %v1319_v4 = vld [vmem:[#allocation5 + $0x70] sm:$0xff]   ;;  %vm1512_vm0 = vmmov 0   ;;  %s1513_s26 = smov [#allocation10]  }
  0x35   :  { %v1316_v1 = vld [vmem:[#allocation5 + $0xf8] sm:$0xff]   ;;  %1156 = vmatprep.subr.bf16.mxu0 %v1315_v0  ;;  %v1320_v5 = vld [vmem:[#allocation5 + $0xf0] sm:$0xff]   ;;  %v1323_v8 = vld [vmem:[#allocation5 + $0x68] sm:$0xff]   ;;  %s1051_s27 = sshll.u32 %s1513_s26, 4  ;;  %s1052_s27 = int_to_ptr.vmem [resolvable:$true] %s1051_s27 }
  0x36   :  { %v1317_v2 = vld [vmem:[#allocation5 + $0x38] sm:$0xff]   ;;  %1178 = vmatprep.subr.bf16.mxu1 %v1316_v1  ;;  %v1321_v6 = vld [vmem:[#allocation5 + $0x30] sm:$0xff]   ;;  %v1324_v9 = vld [vmem:[#allocation5 + $0xe8] sm:$0xff]   ;;  %p1480_p7 = scmp.lt.s32.totalorder %s1052_s27, %s1052_s27 }
  0x37   :  { %v1318_v3 = vld [vmem:[#allocation5 + $0xb8] sm:$0xff]   ;;  %1157 = vmatpush3.bf16.msra.mxu0 %v1317_v2  ;;  %v1322_v7 = vld [vmem:[#allocation5 + $0xb0] sm:$0xff]   ;;  %v1325_v10 = vld [vmem:[#allocation5 + $0x28] sm:$0xff]  }
  0x38   :  { %1179 = vmatpush3.bf16.msra.mxu1 %v1318_v3  ;;  %1158 = vmatprep.subr.bf16.mxu0 %v1319_v4  ;;  %v1326_v11 = vld [vmem:[#allocation5 + $0xa8] sm:$0xff]   ;;  %v1327_v12 = vld [vmem:[#allocation5 + $0x60] sm:$0xff]   ;;  %v1331_v16 = vld [vmem:[#allocation5 + $0x58] sm:$0xff]  }
  0x39   :  { %1180 = vmatprep.subr.bf16.mxu1 %v1320_v5  ;;  %v1328_v13 = vld [vmem:[#allocation5 + $0xe0] sm:$0xff]   ;;  %v1332_v17 = vld [vmem:[#allocation5 + $0xd8] sm:$0xff]   ;;  %v1335_v20 = vld [vmem:[#allocation5 + $0x50] sm:$0xff]  }
  0x3a   :  { %v1329_v14 = vld [vmem:[#allocation5 + $0x20] sm:$0xff]   ;;  %v1333_v18 = vld [vmem:[#allocation5 + $0x18] sm:$0xff]   ;;  %v1336_v21 = vld [vmem:[#allocation5 + $0xd0] sm:$0xff]  }
  0x3b   :  { %1159 = vmatpush3.bf16.msra.mxu0 %v1321_v6  ;;  %v1330_v15 = vld [vmem:[#allocation5 + $0xa0] sm:$0xff]   ;;  %v1334_v19 = vld [vmem:[#allocation5 + $0x98] sm:$0xff]   ;;  %v1337_v22 = vld [vmem:[#allocation5 + $0x10] sm:$0xff]  }
  0x3c   :  { %1181 = vmatpush3.bf16.msra.mxu1 %v1322_v7  ;;  %1160 = vmatprep.subr.bf16.mxu0 %v1323_v8  ;;  %v1338_v23 = vld [vmem:[#allocation5 + $0x90] sm:$0xff]   ;;  %v1339_v24 = vld [vmem:[#allocation5 + $0x48] sm:$0xff]   ;;  %v1343_v28 = vld [vmem:[#allocation5 + $0x40] sm:$0xff]  }
  0x3d   :  { %1182 = vmatprep.subr.bf16.mxu1 %v1324_v9  ;;  %v1340_v25 = vld [vmem:[#allocation5 + $0xc8] sm:$0xff]   ;;  %v1344_v29 = vld [vmem:[#allocation5 + $0xc0] sm:$0xff]   ;;  %v1347_v40 = vld [vmem:[#allocation5 + $0x178] sm:$0xff]  }
  0x3e   :  { %v1341_v26 = vld [vmem:[#allocation5 + $0x8] sm:$0xff]   ;;  %v1345_v30 = vld [vmem:[#allocation5] sm:$0xff]   ;;  %v1348_v41 = vld [vmem:[#allocation5 + $0x1f8] sm:$0xff]  }
  0x3f   :  { %1161 = vmatpush3.bf16.msra.mxu0 %v1325_v10  ;;  %v1342_v27 = vld [vmem:[#allocation5 + $0x88] sm:$0xff]   ;;  %v1346_v31 = vld [vmem:[#allocation5 + $0x80] sm:$0xff]   ;;  %v1349_v42 = vld [vmem:[#allocation5 + $0x138] sm:$0xff]  }
  0x40   :  { %1183 = vmatpush3.bf16.msra.mxu1 %v1326_v11  ;;  %1162 = vmatprep.subr.bf16.mxu0 %v1327_v12  ;;  %v83_v32 = vld [vmem:[#allocation2] sm:$0xff]  ;;  %v84_v34 = vld [vmem:[#allocation2 + $0x8] sm:$0xff]  ;;  %v1350_v43 = vld [vmem:[#allocation5 + $0x1b8] sm:$0xff]  }
  0x41   :  { %1184 = vmatprep.subr.bf16.mxu1 %v1328_v13  ;;  %v87_v33 = vld [vmem:[#allocation2 + $0x20] sm:$0xff]  ;;  %v88_v37 = vld [vmem:[#allocation2 + $0x28] sm:$0xff]  ;;  %v1351_v44 = vld [vmem:[#allocation5 + $0x170] sm:$0xff]  }
  0x42   :  { %v1066_v35 = vcombine.low %v83_v32, %v87_v33  ;;  %v1067_v36 = vcombine.high %v83_v32, %v87_v33  ;;  %v1068_v38 = vcombine.low %v84_v34, %v88_v37  ;;  %v1069_v39 = vcombine.high %v84_v34, %v88_v37  ;;  %v1352_v45 = vld [vmem:[#allocation5 + $0x1f0] sm:$0xff]   ;;  %v1355_v48 = vld [vmem:[#allocation5 + $0x168] sm:$0xff]   ;;  %v1359_v52 = vld [vmem:[#allocation5 + $0x160] sm:$0xff]  }
  0x43   :  { %1163 = vmatpush3.bf16.msra.mxu0 %v1329_v14  ;;  %v1353_v46 = vld [vmem:[#allocation5 + $0x130] sm:$0xff]   ;;  %v1356_v49 = vld [vmem:[#allocation5 + $0x1e8] sm:$0xff]   ;;  %v1360_v53 = vld [vmem:[#allocation5 + $0x1e0] sm:$0xff]  }
  0x44   :  { %1185 = vmatpush3.bf16.msra.mxu1 %v1330_v15  ;;  %1164 = vmatprep.subr.bf16.mxu0 %v1331_v16  ;;  %v1354_v47 = vld [vmem:[#allocation5 + $0x1b0] sm:$0xff]   ;;  %v1357_v50 = vld [vmem:[#allocation5 + $0x128] sm:$0xff]   ;;  %v1361_v54 = vld [vmem:[#allocation5 + $0x120] sm:$0xff]  }
  0x45   :  { %1186 = vmatprep.subr.bf16.mxu1 %v1332_v17  ;;  %682 = vmatprep.mubr.bf16.mxu0 %v1067_v36  ;;  %v1358_v51 = vld [vmem:[#allocation5 + $0x1a8] sm:$0xff]   ;;  %v1362_v55 = vld [vmem:[#allocation5 + $0x1a0] sm:$0xff]   ;;  %v1363_v56 = vld [vmem:[#allocation5 + $0x158] sm:$0xff]   ;;  %v1511_v17 = vmov 0.0  }
  0x46   :  { %723 = vmatprep.mubr.bf16.mxu1 %v1069_v39  ;;  %v1364_v57 = vld [vmem:[#allocation5 + $0x1d8] sm:$0xff]   ;;  %v1367_v60 = vld [vmem:[#allocation5 + $0x150] sm:$0xff]   ;;  %v1371_v0 = vld [vmem:[#allocation5 + $0x148] sm:$0xff]  }
  0x47   :  { %1165 = vmatpush3.bf16.msra.mxu0 %v1333_v18  ;;  %v1365_v58 = vld [vmem:[#allocation5 + $0x118] sm:$0xff]   ;;  %v1368_v61 = vld [vmem:[#allocation5 + $0x1d0] sm:$0xff]   ;;  %v1372_v1 = vld [vmem:[#allocation5 + $0x1c8] sm:$0xff]  }
  0x48   :  { %1187 = vmatpush3.bf16.msra.mxu1 %v1334_v19  ;;  %1166 = vmatprep.subr.bf16.mxu0 %v1335_v20  ;;  %v1366_v59 = vld [vmem:[#allocation5 + $0x198] sm:$0xff]   ;;  %v1369_v62 = vld [vmem:[#allocation5 + $0x110] sm:$0xff]   ;;  %v1373_v2 = vld [vmem:[#allocation5 + $0x108] sm:$0xff]  }
  0x49   :  { %1188 = vmatprep.subr.bf16.mxu1 %v1336_v21  ;;  %v1370_v63 = vld [vmem:[#allocation5 + $0x190] sm:$0xff]   ;;  %v1374_v3 = vld [vmem:[#allocation5 + $0x188] sm:$0xff]   ;;  %v1375_v4 = vld [vmem:[#allocation5 + $0x140] sm:$0xff]  }
  0x4a   :  { %v1376_v5 = vld [vmem:[#allocation5 + $0x1c0] sm:$0xff]   ;;  %v85_v8 = vld [vmem:[#allocation2 + $0x10] sm:$0xff]  ;;  %v86_v12 = vld [vmem:[#allocation2 + $0x18] sm:$0xff] }
  0x4b   :  { %1167 = vmatpush3.bf16.msra.mxu0 %v1337_v22  ;;  %v1377_v6 = vld [vmem:[#allocation5 + $0x100] sm:$0xff]   ;;  %v89_v9 = vld [vmem:[#allocation2 + $0x30] sm:$0xff]  ;;  %v90_v13 = vld [vmem:[#allocation2 + $0x38] sm:$0xff] }
  0x4c   :  { %1189 = vmatpush3.bf16.msra.mxu1 %v1338_v23  ;;  %1168 = vmatprep.subr.bf16.mxu0 %v1339_v24  ;;  %v1378_v7 = vld [vmem:[#allocation5 + $0x180] sm:$0xff]   ;;  %v1070_v10 = vcombine.low %v85_v8, %v89_v9  ;;  %v1071_v11 = vcombine.high %v85_v8, %v89_v9  ;;  %v1072_v14 = vcombine.low %v86_v12, %v90_v13  ;;  %v1379_v16 = vld [vmem:[#allocation7 + $0x38] sm:$0xff]   ;;  %v1380_v18 = vld [vmem:[#allocation7 + $0x30] sm:$0xff]  }
  0x4d   :  { %1190 = vmatprep.subr.bf16.mxu1 %v1340_v25  ;;  %v1073_v15 = vcombine.high %v86_v12, %v90_v13  ;;  %v1381_v19 = vld [vmem:[#allocation7 + $0x28] sm:$0xff]   ;;  %v1382_v20 = vld [vmem:[#allocation7 + $0x20] sm:$0xff]   ;;  %v1383_v21 = vld [vmem:[#allocation7 + $0x18] sm:$0xff]  }
  0x4e   :  { %v1384_v22 = vld [vmem:[#allocation7 + $0x10] sm:$0xff]   ;;  %v1385_v23 = vld [vmem:[#allocation7 + $0x8] sm:$0xff]   ;;  %v1386_v24 = vld [vmem:[#allocation7] sm:$0xff]  }
  0x4f   :  { %1169 = vmatpush3.bf16.msra.mxu0 %v1341_v26  ;;  %v1387_v25 = vld [vmem:[#allocation8 + $0x38] sm:$0xff]   ;;  %v1388_v26 = vld [vmem:[#allocation8 + $0x30] sm:$0xff]   ;;  %v1065_v37 = vld [vmem:[%s1609_s2] ss:$0 sm:$0xff] }
  0x50   :  { %1191 = vmatpush3.bf16.msra.mxu1 %v1342_v27  ;;  %1170 = vmatprep.subr.bf16.mxu0 %v1343_v28  ;;  %v1389_v27 = vld [vmem:[#allocation8 + $0x28] sm:$0xff]   ;;  %v1390_v28 = vld [vmem:[#allocation8 + $0x20] sm:$0xff]  }
  0x51   :  { %1192 = vmatprep.subr.bf16.mxu1 %v1344_v29  ;;  %v1391_v29 = vld [vmem:[#allocation8 + $0x18] sm:$0xff]  }
  0x53   :  { %1171 = vmatpush3.bf16.msra.mxu0 %v1345_v30 }
  0x54   :  { %1193 = vmatpush3.bf16.msra.mxu1 %v1346_v31  ;;  %1200 = vmatprep.subr.bf16.mxu0 %v1347_v40 }
  0x55   :  { %1222 = vmatprep.subr.bf16.mxu1 %v1348_v41 }
  0x56   :  { %683 = vmatmul.mubr.bf16.vlgmr.msra.gmra.mxu0 %v1066_v35 }
  0x57   :  { %724 = vmatmul.mubr.bf16.vlgmr.msra.gmra.mxu1 %v1068_v38  ;;  %1201 = vmatpush3.bf16.msra.mxu0 %v1349_v42 }
  0x58   :  { %1223 = vmatpush3.bf16.msra.mxu1 %v1350_v43  ;;  %1202 = vmatprep.subr.bf16.mxu0 %v1351_v44 }
  0x59   :  { %1224 = vmatprep.subr.bf16.mxu1 %v1352_v45  ;;  %764 = vmatprep.mubr.bf16.mxu0 %v1071_v11 }
  0x5a   :  { %805 = vmatprep.mubr.bf16.mxu1 %v1073_v15  ;;  %v1147_v15 = vld [vmem:[%s1613_s6] ss:$0 sm:$0xff] }
  0x5b   :  { %1203 = vmatpush3.bf16.msra.mxu0 %v1353_v46 }
  0x5c   :  { %1225 = vmatpush3.bf16.msra.mxu1 %v1354_v47  ;;  %1204 = vmatprep.subr.bf16.mxu0 %v1355_v48 }
  0x5d   :  { %1226 = vmatprep.subr.bf16.mxu1 %v1356_v49 }
  0x5f   :  { %1205 = vmatpush3.bf16.msra.mxu0 %v1357_v50 }
  0x60   :  { %1227 = vmatpush3.bf16.msra.mxu1 %v1358_v51  ;;  %1206 = vmatprep.subr.bf16.mxu0 %v1359_v52 }
  0x61   :  { %1228 = vmatprep.subr.bf16.mxu1 %v1360_v53 }
  0x63   :  { %1207 = vmatpush3.bf16.msra.mxu0 %v1361_v54 }
  0x64   :  { %1229 = vmatpush3.bf16.msra.mxu1 %v1362_v55  ;;  %1208 = vmatprep.subr.bf16.mxu0 %v1363_v56 }
  0x65   :  { %1230 = vmatprep.subr.bf16.mxu1 %v1364_v57 }
  0x67   :  { %1209 = vmatpush3.bf16.msra.mxu0 %v1365_v58 }
  0x68   :  { %1231 = vmatpush3.bf16.msra.mxu1 %v1366_v59  ;;  %1210 = vmatprep.subr.bf16.mxu0 %v1367_v60 }
  0x69   :  { %1232 = vmatprep.subr.bf16.mxu1 %v1368_v61 }
  0x6b   :  { %1211 = vmatpush3.bf16.msra.mxu0 %v1369_v62 }
  0x6c   :  { %1233 = vmatpush3.bf16.msra.mxu1 %v1370_v63  ;;  %1212 = vmatprep.subr.bf16.mxu0 %v1371_v0 }
  0x6d   :  { %1234 = vmatprep.subr.bf16.mxu1 %v1372_v1 }
  0x6f   :  { %1213 = vmatpush3.bf16.msra.mxu0 %v1373_v2  ;;  %v1392_v2 = vld [vmem:[#allocation8 + $0x10] sm:$0xff]  }
  0x70   :  { %1235 = vmatpush3.bf16.msra.mxu1 %v1374_v3  ;;  %1214 = vmatprep.subr.bf16.mxu0 %v1375_v4  ;;  %v1393_v3 = vld [vmem:[#allocation8 + $0x8] sm:$0xff]   ;;  %v1394_v4 = vld [vmem:[#allocation8] sm:$0xff]  }
  0x71   :  { %1236 = vmatprep.subr.bf16.mxu1 %v1376_v5  ;;  %v1138_v5 = vld [vmem:[%s1611_s4] ss:$0 sm:$0xff]  ;;  %s1475_s4 = scalar_lea.vmem %s1052_s27, 256 }
  0x72   :  { %p1476_p6 = scmp.ne.s32.totalorder %s1052_s27, %s1475_s4  ;;  %p1481_p8 = scmp.lt.s32.totalorder %s1475_s4, %s1475_s4 }
  0x73   :  { %1215 = vmatpush3.bf16.msra.mxu0 %v1377_v6 }
  0x74   :  { %1237 = vmatpush3.bf16.msra.mxu1 %v1378_v7  ;;  %1262 = vmatprep.subr.bf16.mxu0 %v1511_v17  ;;  %p1482_p9 = por %p1481_p8, %p1480_p7 }
  0x75   :  { %1282 = vmatprep.subr.bf16.mxu1 %v1511_v17 }
  0x76   :  { %765 = vmatmul.mubr.bf16.vlgmr.msra.gmra.mxu0 %v1070_v10  ;;  %p1483_p10 = pnand %p1482_p9, %p1476_p6 }
  0x77   :  { %806 = vmatmul.mubr.bf16.vlgmr.msra.gmra.mxu1 %v1072_v14  ;;  %1263 = vmatpush3.bf16.msra.mxu0 %v1379_v16 }
  0x78   :  { %1264 = vmatprep.subr.bf16.mxu0 %v1511_v17  ;;  %1278 = vmatprep.mubr.msk.bf16.mxu0 %vm1512_vm0, %v1511_v17 }
  0x79   :  { %1298 = vmatprep.mubr.msk.bf16.mxu1 %vm1512_vm0, %v1511_v17  ;;  %1283 = vmatpush3.bf16.msra.mxu1 %v1387_v25 }
  0x7a   :  { %1284 = vmatprep.subr.bf16.mxu1 %v1511_v17 }
  0x7b   :  { %1265 = vmatpush3.bf16.msra.mxu0 %v1380_v18 }
  0x7c   :  { %1266 = vmatprep.subr.bf16.mxu0 %v1511_v17 }
  0x7d   :  { %1285 = vmatpush3.bf16.msra.mxu1 %v1388_v26 }
  0x7e   :  { %1286 = vmatprep.subr.bf16.mxu1 %v1511_v17 }
  0x7f   :  { %1267 = vmatpush3.bf16.msra.mxu0 %v1381_v19 }
  0x80   :  { %1268 = vmatprep.subr.bf16.mxu0 %v1511_v17 }
  0x81   :  { %1287 = vmatpush3.bf16.msra.mxu1 %v1389_v27 }
  0x82   :  { %1288 = vmatprep.subr.bf16.mxu1 %v1511_v17 }
  0x83   :  { %1269 = vmatpush3.bf16.msra.mxu0 %v1382_v20 }
  0x84   :  { %1270 = vmatprep.subr.bf16.mxu0 %v1511_v17 }
  0x85   :  { %1289 = vmatpush3.bf16.msra.mxu1 %v1390_v28 }
  0x86   :  { %1290 = vmatprep.subr.bf16.mxu1 %v1511_v17 }
  0x87   :  { %1271 = vmatpush3.bf16.msra.mxu0 %v1383_v21 }
  0x88   :  { %1272 = vmatprep.subr.bf16.mxu0 %v1511_v17 }
  0x89   :  { %1291 = vmatpush3.bf16.msra.mxu1 %v1391_v29 }
  0x8a   :  { %1292 = vmatprep.subr.bf16.mxu1 %v1511_v17 }
  0x8b   :  { %1273 = vmatpush3.bf16.msra.mxu0 %v1384_v22 }
  0x8c   :  { %1274 = vmatprep.subr.bf16.mxu0 %v1511_v17 }
  0x8d   :  { %1293 = vmatpush3.bf16.msra.mxu1 %v1392_v2 }
  0x8e   :  { %1294 = vmatprep.subr.bf16.mxu1 %v1511_v17 }
  0x8f   :  { %1275 = vmatpush3.bf16.msra.mxu0 %v1385_v23 }
  0x90   :  { %1276 = vmatprep.subr.bf16.mxu0 %v1511_v17 }
  0x91   :  { %1295 = vmatpush3.bf16.msra.mxu1 %v1393_v3 }
  0x92   :  { %1296 = vmatprep.subr.bf16.mxu1 %v1511_v17 }
  0x93   :  { %1277 = vmatpush3.bf16.msra.mxu0 %v1386_v24 }
  0x95   :  { %1297 = vmatpush3.bf16.msra.mxu1 %v1394_v4 }
 0x116   :  { %v1172_v30 = vpop.f32.mrf.mxu0 }
 0x117   :  { %v1194_v31 = vpop.f32.mrf.mxu1 }
 0x118   :  { %v1173_v32 = vpop.f32.mrf.mxu0 }
 0x119   :  { %v1195_v33 = vpop.f32.mrf.mxu1  ;;  %v1174_v35 = vadd.f32 %v1173_v32, %v1172_v30 }
 0x11a   :  { %v1175_v34 = vpop.f32.mrf.mxu0  ;;  %v1196_v40 = vadd.f32 %v1195_v33, %v1194_v31 }
 0x11b   :  { %v1197_v36 = vpop.f32.mrf.mxu1  ;;  %v685_v39 = vadd.f32 %v1174_v35, %v1065_v37 }
 0x11c   :  { %v1176_v38 = vpop.f32.mrf.mxu0 }
 0x11d   :  { %v1177_v41 = vadd.f32 %v1176_v38, %v1175_v34  ;;  %v1198_v42 = vpop.f32.mrf.mxu1  ;;  %v726_v46 = vadd.f32 %v1196_v40, %v685_v39 }
 0x11e   :  { %v1199_v51 = vadd.f32 %v1198_v42, %v1197_v36 }
 0x11f   :  { %v688_v47 = vadd.f32 %v1177_v41, %v1065_v37 }
 0x121   :  { %v729_v55 = vadd.f32 %v1199_v51, %v688_v47 }
 0x136   :  { %v1216_v43 = vpop.f32.mrf.mxu0 }
 0x137   :  { %v1238_v44 = vpop.f32.mrf.mxu1 }
 0x138   :  { %v1217_v45 = vpop.f32.mrf.mxu0 }
 0x139   :  { %v1218_v48 = vadd.f32 %v1217_v45, %v1216_v43  ;;  %v1239_v49 = vpop.f32.mrf.mxu1 }
 0x13a   :  { %v1219_v50 = vpop.f32.mrf.mxu0  ;;  %v1240_v56 = vadd.f32 %v1239_v49, %v1238_v44 }
 0x13b   :  { %v767_v52 = vadd.f32 %v1218_v48, %v726_v46  ;;  %v1241_v53 = vpop.f32.mrf.mxu1 }
 0x13c   :  { %v1220_v54 = vpop.f32.mrf.mxu0 }
 0x13d   :  { %v1221_v57 = vadd.f32 %v1220_v54, %v1219_v50  ;;  %v1242_v58 = vpop.f32.mrf.mxu1  ;;  %v808_v59 = vadd.f32 %v1240_v56, %v767_v52 }
 0x13e   :  { %v1243_v61 = vadd.f32 %v1242_v58, %v1241_v53 }
 0x13f   :  { %v770_v60 = vadd.f32 %v1221_v57, %v729_v55  ;;  %v814_v63 = vmax.f32 %v808_v59, 0.0 }
 0x141   :  { %v811_v62 = vadd.f32 %v1243_v61, %v770_v60 }
 0x143   :  { %v815_v0 = vmax.f32 %v811_v62, 0.0 }
 0x145   :  { %v833_v1 = vpack.c.bf16 %v815_v0, %v814_v63 }
 0x147   :  { %1279 = vmatmul.mubr.bf16.vlgmr.msra.gmra.mxu0 %v833_v1 }
 0x207   :  { %v922_v6 = vpop.f32.mrf.mxu0 }
 0x208   :  { %v923_v8 = vadd.f32 %v1138_v5, %v922_v6 }
 0x209   :  { %v1280_v7 = vpop.f32.mrf.mxu0 }
 0x20a   :  { %v929_v12 = vmax.f32 %v923_v8, 0.0 }
 0x20b   :  { %v925_v9 = vpop.f32.mrf.mxu0 }
 0x20c   :  { %v926_v10 = vadd.f32 %v1138_v5, %v925_v9 }
 0x20d   :  { %v1281_v11 = vpop.f32.mrf.mxu0 }
 0x20e   :  { %v930_v13 = vmax.f32 %v926_v10, 0.0 }
 0x210   :  { %v948_v14 = vpack.c.bf16 %v930_v13, %v929_v12 }
 0x212   :  { %1299 = vmatmul.mubr.bf16.vlgmr.msra.gmra.mxu1 %v948_v14 }
 0x2d2   :  { %v1037_v16 = vpop.f32.mrf.mxu1 }
 0x2d3   :  { %v1038_v17 = vadd.f32 %v1147_v15, %v1037_v16 }
 0x2d4   :  { %v1300_v18 = vpop.f32.mrf.mxu1 }
 0x2d5   :  { %1044 = vst [vmem:[#allocation10] sm:$0xff] %v1038_v17 }
 0x2d6   :  { %v1040_v19 = vpop.f32.mrf.mxu1 }
 0x2d7   :  { %v1041_v20 = vadd.f32 %v1147_v15, %v1040_v19 }
 0x2d8   :  { %v1301_v21 = vpop.f32.mrf.mxu1 }
 0x2d9   :  { %1045 = vst [vmem:[#allocation10 + $0x8] sm:$0xff] %v1041_v20 }
 0x2da   :  { %1486 = shalt.err (!%p1483_p10)
}
 0x2db   :  { %s1514_s28 = smov 128   ;;  %s1515_s6 = smov 8  }
 0x2dc   :  { %1057 = dma.vmem_to_hbm [thread:$0]  %s1052_s27, 256, %s1614_s7, [#allocation4], %s1514_s28, %s1514_s28, %s1515_s6  }
 0x2dd   :  { %1501 = dma.done.wait [#allocation4], 256  }
 0x2de   :  { %1502 = vsyncadd [#allocation4], 4294967040 }
 0x2df   :  { %1061 = vsyncpa [#allocation3], 1 }
 0x2e0   :  { %1062 = vsyncpa [#allocation6], 1 }
 0x2e1   :  { %1063 = vsyncpa [#allocation9], 1 }
 0x2e2   :  { %1064 = vsyncpa [#allocation4], 1 }

</bundles_post_ra>
